<compile_context>
chip_gen: v6e
topology: v6e:2x2x1
jax: 0.10.0
libtpu: 0.0.40
codegen_flags: <defaults>
</compile_context>

<pallas_src>
import functools

import jax
import jax.numpy as jnp
from jax.experimental import pallas as pl
from jax.experimental.pallas import tpu as pltpu

_LANE = 128


def _critic_kernel(xT_ref, w1_ref, b1_ref, w2_ref, b2_ref, w3_ref, b3_ref, v_ref):
    """Fused 3-layer MLP on one batch tile (batch on the LANE axis throughout).

    xT_ref : (S, TB)   state tile, transposed (bf16 MXU operand)
    w1_ref : (HP, S)   layer-1 weight, PyTorch (out, in) layout, out padded to 128
    b1_ref : (HP, 1)   layer-1 bias column (f32)
    w2_ref : (HP, HP)  layer-2 weight (bf16)
    b2_ref : (HP, 1)   layer-2 bias column (f32)
    w3_ref : (HP, 1)   layer-3 weight column (f32)
    b3_ref : (1,)      layer-3 bias (SMEM scalar)
    v_ref  : (1, TB)   lane-dense value row for this tile
    """
    xT = xT_ref[...]                                                # (S, TB)
    # Layers 1 & 2 on the MXU: bf16 operands, f32 accumulation; tanh on the EUP.
    z1 = jnp.tanh(
        jnp.dot(w1_ref[...], xT, preferred_element_type=jnp.float32)
        + b1_ref[...]
    )                                                               # (HP, TB) f32
    z2 = jnp.tanh(
        jnp.dot(w2_ref[...], z1.astype(w2_ref.dtype),
                preferred_element_type=jnp.float32)
        + b2_ref[...]
    )                                                               # (HP, TB) f32
    # Layer 3: per-lane VPU multiply + sublane reduction (no N=1 MXU pass, no
    # relayout — the result is already lane-dense). Padded rows are exact zeros.
    v = jnp.sum(z2 * w3_ref[...], axis=0, keepdims=True) + b3_ref[0]  # (1, TB)
    v_ref[...] = v.astype(v_ref.dtype)


def _num_tensorcores_per_device():
    """TensorCores per JAX device: 1 on v5e/v6e, 2 on v7x (best effort)."""
    try:
        n = getattr(jax.devices()[0], "num_cores", 1)
        if isinstance(n, int) and 1 <= n <= 8:
            return n
    except Exception:
        pass
    return 1


def _choose_tile_b(B, num_cores, max_tile=512):
    """Pick the batch tile (lives on the lane axis).

    * Single-TC chips (v5e/v6e): whole batch in ONE grid step -> no per-step
      pipeline overhead on a kernel whose total work is only a few us.
    * Multi-TC chips (v7x): one lane-aligned tile per core so the "parallel"
      grid axis can shard across TensorCores.
    * Large batches: cap the per-step tile at `max_tile` to bound vreg /
      VMEM-staging pressure of the (128, tile_b) f32 intermediates.
    Tile must be a multiple of 128 (lane axis) unless it covers all of B.
    """
    if B % 128 != 0:
        return B                       # awkward batch: one full-extent block
    tile = B
    if num_cores > 1 and B % num_cores == 0 and (B // num_cores) % 128 == 0:
        tile = B // num_cores
    while tile > max_tile and tile % 256 == 0:
        tile //= 2
    return tile


@functools.partial(jax.jit, static_argnames=("tile_b",))
def critic_forward(state, prepped_params, tile_b=None):
    """state: [B, state_dim] float32 -> value: [B, 1] float32."""
    w1p, b1c, w2p, b2c, w3c, b3s = prepped_params
    B, S = state.shape
    HP = w1p.shape[0]
    if tile_b is None:
        tile_b = _choose_tile_b(B, _num_tensorcores_per_device())
    assert B % tile_b == 0, "batch must be divisible by tile_b"
    grid_b = B // tile_b

    # Transposed dataflow: batch on the lane axis end-to-end; bf16 operand for
    # the MXU (also halves the state DMA bytes).
    xT = state.T.astype(w1p.dtype)                                  # (S, B)

    bytes_accessed = (
        xT.size * xT.dtype.itemsize
        + sum(a.size * a.dtype.itemsize for a in (w1p, b1c, w2p, b2c, w3c, b3s))
        + B * 4
    )
    cost = pl.CostEstimate(
        flops=2 * B * (S * HP + HP * HP + HP),
        transcendentals=2 * B * HP,
        bytes_accessed=bytes_accessed,
    )

    out = pl.pallas_call(
        _critic_kernel,
        out_shape=jax.ShapeDtypeStruct((1, B), jnp.float32),
        grid_spec=pltpu.PrefetchScalarGridSpec(
            num_scalar_prefetch=0,
            grid=(grid_b,),
            in_specs=[
                pl.BlockSpec((S, tile_b), lambda i: (0, i)),        # state^T tile
                pl.BlockSpec((HP, S), lambda i: (0, 0)),            # W1 (padded)
                pl.BlockSpec((HP, 1), lambda i: (0, 0)),            # b1 column
                pl.BlockSpec((HP, HP), lambda i: (0, 0)),           # W2 (padded)
                pl.BlockSpec((HP, 1), lambda i: (0, 0)),            # b2 column
                pl.BlockSpec((HP, 1), lambda i: (0, 0)),            # W3 column
                pl.BlockSpec(memory_space=pltpu.MemorySpace.SMEM),  # b3 scalar
            ],
            out_specs=pl.BlockSpec((1, tile_b), lambda i: (0, i)),  # lane-dense row
        ),
        # On v7x, "parallel" should shard grid_b=2 across the two TCs; if
        # profiling shows both blocks on one core, switch to pltpu.CORE_PARALLEL.
        compiler_params=pltpu.CompilerParams(
            dimension_semantics=("parallel",),
        ),
        cost_estimate=cost,
    )(xT, w1p, b1c, w2p, b2c, w3c, b3s)
    # Column j of the (1, B) output is batch row j; reshape recovers (B, 1).
    return out.reshape(B, 1)


def init_critic_params(key, state_dim, hidden_dim=64):
    """PyTorch nn.Linear-style init: W is (out, in), U(-1/sqrt(fan_in), ...)."""
    ks = jax.random.split(key, 6)

    def linear(kw, kb, fan_in, fan_out):
        bound = 1.0 / (fan_in ** 0.5)
        w = jax.random.uniform(kw, (fan_out, fan_in), jnp.float32, -bound, bound)
        b = jax.random.uniform(kb, (fan_out,), jnp.float32, -bound, bound)
        return w, b

    w1, b1 = linear(ks[0], ks[1], state_dim, hidden_dim)
    w2, b2 = linear(ks[2], ks[3], hidden_dim, hidden_dim)
    w3, b3 = linear(ks[4], ks[5], hidden_dim, 1)
    return (w1, b1, w2, b2, w3, b3)


def prep_critic_params(params, lane=_LANE, matmul_dtype=jnp.bfloat16):
    """Keep PyTorch-native (out, in) weights, zero-pad hidden to 128 (exact:
    tanh(0)=0, padded rows are zero), cast MXU operands to bf16, reshape biases
    / W3 into (HP, 1) columns for the transposed dataflow, b3 -> SMEM scalar."""
    w1, b1, w2, b2, w3, b3 = params
    H = w1.shape[0]
    HP = ((H + lane - 1) // lane) * lane
    p = HP - H
    w1p = jnp.pad(w1, ((0, p), (0, 0))).astype(matmul_dtype)        # (HP, S)
    b1c = jnp.pad(b1.reshape(H, 1), ((0, p), (0, 0)))               # (HP, 1) f32
    w2p = jnp.pad(w2, ((0, p), (0, p))).astype(matmul_dtype)        # (HP, HP)
    b2c = jnp.pad(b2.reshape(H, 1), ((0, p), (0, 0)))               # (HP, 1) f32
    w3c = jnp.pad(w3.reshape(H, 1), ((0, p), (0, 0)))               # (HP, 1) f32
    b3s = b3.reshape(1)                                             # (1,) SMEM
    return (w1p, b1c, w2p, b2c, w3c, b3s)


def critic_reference(state, params):
    """Pure-JAX f32 reference of the PyTorch forward, for correctness checking."""
    w1, b1, w2, b2, w3, b3 = params
    z = jnp.tanh(state @ w1.T + b1)
    z = jnp.tanh(z @ w2.T + b2)
    return z @ w3.T + b3


if __name__ == "__main__":
    key = jax.random.PRNGKey(0)
    k_param, k_state = jax.random.split(key)

    batch, state_dim, hidden_dim = 512, 16, 64
    params = init_critic_params(k_param, state_dim, hidden_dim)
    prepped = prep_critic_params(params)
    state = jax.random.normal(k_state, (batch, state_dim), dtype=jnp.float32)

    v = critic_forward(state, prepped)   # 1 grid step on v5e/v6e, 2 on v7x
    v = jax.block_until_ready(v)

    v_ref = critic_reference(state, params)
    assert v.shape == (batch, 1)
    # bf16 MXU operands (f32 accumulation) -> relaxed tolerance vs. f32 reference.
    err = float(jnp.max(jnp.abs(v - v_ref)))
    assert err < 5e-2, err

    print("KERNEL_OK")
</pallas_src>

<mosaic_0001>
module attributes {stable_mosaic.version = 11 : i64} {
  func.func @_critic_kernel(%arg0: i32, %arg1: memref<16x512xbf16, #tpu.memory_space<vmem>>, %arg2: memref<128x16xbf16, #tpu.memory_space<vmem>>, %arg3: memref<128x1xf32, #tpu.memory_space<vmem>>, %arg4: memref<128x128xbf16, #tpu.memory_space<vmem>>, %arg5: memref<128x1xf32, #tpu.memory_space<vmem>>, %arg6: memref<128x1xf32, #tpu.memory_space<vmem>>, %arg7: memref<1xf32, #tpu.memory_space<smem>>, %arg8: memref<1x512xf32, #tpu.memory_space<vmem>>) attributes {dimension_semantics = [#tpu.dimension_semantics<parallel>], iteration_bounds = array<i64: 1>, scalar_prefetch = 0 : i64, scratch_operands = 0 : i64, tpu.core_type = #tpu.core_type<tc>, window_params = [{transform_indices = @transform_0, window_bounds = array<i64: 16, 512>}, {pipeline_mode = #tpu.pipeline_mode<synchronous>, transform_indices = @transform_1, window_bounds = array<i64: 128, 16>}, {pipeline_mode = #tpu.pipeline_mode<synchronous>, transform_indices = @transform_2, window_bounds = array<i64: 128, 1>}, {pipeline_mode = #tpu.pipeline_mode<synchronous>, transform_indices = @transform_3, window_bounds = array<i64: 128, 128>}, {pipeline_mode = #tpu.pipeline_mode<synchronous>, transform_indices = @transform_4, window_bounds = array<i64: 128, 1>}, {pipeline_mode = #tpu.pipeline_mode<synchronous>, transform_indices = @transform_5, window_bounds = array<i64: 128, 1>}, {transform_indices = @transform_6, window_bounds = array<i64: 1>}, {transform_indices = @transform_7, window_bounds = array<i64: 1, 512>}]} {
    %c0 = arith.constant 0 : index
    %c0_0 = arith.constant 0 : index
    %0 = vector.load %arg1[%c0, %c0_0] : memref<16x512xbf16, #tpu.memory_space<vmem>>, vector<16x512xbf16>
    %c0_1 = arith.constant 0 : index
    %c0_2 = arith.constant 0 : index
    %1 = vector.load %arg2[%c0_1, %c0_2] : memref<128x16xbf16, #tpu.memory_space<vmem>>, vector<128x16xbf16>
    %cst = arith.constant dense<0.000000e+00> : vector<128x512xf32>
    %2 = tpu.matmul %1, %0, %cst {dimension_numbers = #tpu.dot_dimension_numbers<[1], [0], [0], [1], [0, 0, 1, 1], [], []>} : vector<128x16xbf16>, vector<16x512xbf16>, vector<128x512xf32> -> vector<128x512xf32>
    %c0_3 = arith.constant 0 : index
    %c0_4 = arith.constant 0 : index
    %3 = vector.load %arg3[%c0_3, %c0_4] : memref<128x1xf32, #tpu.memory_space<vmem>>, vector<128x1xf32>
    %4 = vector.broadcast %3 : vector<128x1xf32> to vector<128x512xf32>
    %5 = arith.addf %2, %4 : vector<128x512xf32>
    %6 = math.tanh %5 : vector<128x512xf32>
    %c0_5 = arith.constant 0 : index
    %c0_6 = arith.constant 0 : index
    %7 = vector.load %arg4[%c0_5, %c0_6] : memref<128x128xbf16, #tpu.memory_space<vmem>>, vector<128x128xbf16>
    %8 = arith.truncf %6 : vector<128x512xf32> to vector<128x512xbf16>
    %cst_7 = arith.constant dense<0.000000e+00> : vector<128x512xf32>
    %9 = tpu.matmul %7, %8, %cst_7 {dimension_numbers = #tpu.dot_dimension_numbers<[1], [0], [0], [1], [0, 0, 1, 1], [], []>} : vector<128x128xbf16>, vector<128x512xbf16>, vector<128x512xf32> -> vector<128x512xf32>
    %c0_8 = arith.constant 0 : index
    %c0_9 = arith.constant 0 : index
    %10 = vector.load %arg5[%c0_8, %c0_9] : memref<128x1xf32, #tpu.memory_space<vmem>>, vector<128x1xf32>
    %11 = vector.broadcast %10 : vector<128x1xf32> to vector<128x512xf32>
    %12 = arith.addf %9, %11 : vector<128x512xf32>
    %13 = math.tanh %12 : vector<128x512xf32>
    %c0_10 = arith.constant 0 : index
    %c0_11 = arith.constant 0 : index
    %14 = vector.load %arg6[%c0_10, %c0_11] : memref<128x1xf32, #tpu.memory_space<vmem>>, vector<128x1xf32>
    %15 = vector.broadcast %14 : vector<128x1xf32> to vector<128x512xf32>
    %16 = arith.mulf %13, %15 : vector<128x512xf32>
    %cst_12 = arith.constant dense<0.000000e+00> : vector<512xf32>
    %17 = vector.multi_reduction <add>, %16, %cst_12 [0] : vector<128x512xf32> to vector<512xf32>
    %18 = vector.shape_cast %17 : vector<512xf32> to vector<1x512xf32>
    %c0_13 = arith.constant 0 : index
    %19 = memref.load %arg7[%c0_13] : memref<1xf32, #tpu.memory_space<smem>>
    %20 = vector.broadcast %19 : f32 to vector<1x512xf32>
    %21 = arith.addf %18, %20 : vector<1x512xf32>
    %c0_14 = arith.constant 0 : index
    %c0_15 = arith.constant 0 : index
    %22 = vector.load %arg8[%c0_14, %c0_15] : memref<1x512xf32, #tpu.memory_space<vmem>>, vector<1x512xf32>
    tpu.vector_store %arg8[%c0_14, %c0_15], %21 {strides = array<i32>} : memref<1x512xf32, #tpu.memory_space<vmem>>, vector<1x512xf32>,
    return
  }
  func.func @transform_0(%arg0: i32) -> (i32, i32) {
    %c0_i32 = arith.constant 0 : i32
    %c0_i32_0 = arith.constant 0 : i32
    return %c0_i32, %arg0 : i32, i32
  }
  func.func @transform_1(%arg0: i32) -> (i32, i32) {
    %c0_i32 = arith.constant 0 : i32
    %c0_i32_0 = arith.constant 0 : i32
    %c0_i32_1 = arith.constant 0 : i32
    return %c0_i32, %c0_i32_0 : i32, i32
  }
  func.func @transform_2(%arg0: i32) -> (i32, i32) {
    %c0_i32 = arith.constant 0 : i32
    %c0_i32_0 = arith.constant 0 : i32
    %c0_i32_1 = arith.constant 0 : i32
    return %c0_i32, %c0_i32_0 : i32, i32
  }
  func.func @transform_3(%arg0: i32) -> (i32, i32) {
    %c0_i32 = arith.constant 0 : i32
    %c0_i32_0 = arith.constant 0 : i32
    %c0_i32_1 = arith.constant 0 : i32
    return %c0_i32, %c0_i32_0 : i32, i32
  }
  func.func @transform_4(%arg0: i32) -> (i32, i32) {
    %c0_i32 = arith.constant 0 : i32
    %c0_i32_0 = arith.constant 0 : i32
    %c0_i32_1 = arith.constant 0 : i32
    return %c0_i32, %c0_i32_0 : i32, i32
  }
  func.func @transform_5(%arg0: i32) -> (i32, i32) {
    %c0_i32 = arith.constant 0 : i32
    %c0_i32_0 = arith.constant 0 : i32
    %c0_i32_1 = arith.constant 0 : i32
    return %c0_i32, %c0_i32_0 : i32, i32
  }
  func.func @transform_6(%arg0: i32) -> i32 {
    %c0_i32 = arith.constant 0 : i32
    %c0_i32_0 = arith.constant 0 : i32
    return %c0_i32 : i32
  }
  func.func @transform_7(%arg0: i32) -> (i32, i32) {
    %c0_i32 = arith.constant 0 : i32
    %c0_i32_0 = arith.constant 0 : i32
    return %c0_i32, %arg0 : i32, i32
  }
}

</mosaic_0001>

<bundles_post_ra>
// kernel: critic_forward.1
= control target key start
LH: loop header
LB: loop body
LE: loop exit
PB: predicated region body
PF: predicated region fallthrough
CT: control target
= control target key end

     0   :  { %v2420_v2 = vmov 0   ;;  %vm205_vm0 = vcmask 130048   ;;  %s2412_s0 = inlined_call_operand.vmem [shape: bf16[16,512], index: 0, kind: input, shape index: {}]   ;;  %s2413_s1 = inlined_call_operand.vmem [shape: bf16[128,16], index: 1, kind: input, shape index: {}]   ;;  %s2414_s2 = inlined_call_operand.vmem [shape: f32[128,1], index: 2, kind: input, shape index: {}]   ;;  %s2415_s3 = inlined_call_operand.vmem [shape: bf16[128,128], index: 3, kind: input, shape index: {}]   ;;  %s2416_s4 = inlined_call_operand.vmem [shape: f32[128,1], index: 4, kind: input, shape index: {}]   ;;  %s2417_s5 = inlined_call_operand.vmem [shape: f32[128,1], index: 5, kind: input, shape index: {}]   ;;  %s2418_s6 = inlined_call_operand.<no memory space> [shape: f32[1], index: 6, kind: input, shape index: {}]   ;;  %s2419_s7 = inlined_call_operand.hbm [shape: f32[1,512], index: 7, kind: output, shape index: {}]  }
   0x1   :  { %v1341_v0 = vld [vmem:[%s2412_s0 + $0x4] ss:$16 sps:$4 sm:$0xff]   ;;  %v1343_v1 = vld [vmem:[%s2412_s0 + $0xc] ss:$16 sps:$4 sm:$0xff]   ;;  %262 = vmatprep.mubr.bf16.mxu0 %v2420_v2  ;;  %375 = vmatprep.mubr.bf16.mxu1 %v2420_v2  ;;  %v1345_v3 = vld [vmem:[%s2412_s0] ss:$16 sps:$4 sm:$0xff]  }
   0x2   :  { %244 = vmatprep.subr.bf16.mxu0 %v1341_v0  ;;  %v1346_v4 = vld [vmem:[%s2412_s0 + $0x8] ss:$16 sps:$4 sm:$0xff]   ;;  %1339 = vset.pattern.permute.xlu0 %v2420_v2  ;;  %v1347_v5 = vld [vmem:[%s2413_s1] sm:$0xff]   ;;  %v63_v6 = vld [vmem:[%s2414_s2 + $0x70] sm:$0xff] }
   0x3   :  { %357 = vmatprep.subr.bf16.mxu1 %v1343_v1  ;;  %1340 = vset.pattern.permute.xlu1 %v2420_v2  ;;  %v61_v7 = vld [vmem:[%s2414_s2 + $0x60] sm:$0xff]  ;;  %v64_v8 = vld [vmem:[%s2414_s2 + $0x78] sm:$0xff]  ;;  %v1348_v9 = vld [vmem:[%s2413_s1 + $0x8] sm:$0xff]  }
   0x4   :  { %245 = vmatpush1.bf16.msra.mxu0 %v1345_v3  ;;  %358 = vmatpush1.bf16.msra.mxu1 %v1346_v4  ;;  %v62_v10 = vld [vmem:[%s2414_s2 + $0x68] sm:$0xff]  ;;  %v59_v11 = vld [vmem:[%s2414_s2 + $0x50] sm:$0xff]  ;;  %v60_v12 = vld [vmem:[%s2414_s2 + $0x58] sm:$0xff] }
   0x5   :  { %137 = vperm.xlu0 %1339, %v63_v6   ;;  %127 = vperm.xlu1 %1340, %v61_v7   ;;  %v57_v13 = vld [vmem:[%s2414_s2 + $0x40] sm:$0xff]  ;;  %v1349_v14 = vld [vmem:[%s2413_s1 + $0x10] sm:$0xff]   ;;  %v58_v15 = vld [vmem:[%s2414_s2 + $0x48] sm:$0xff] }
   0x6   :  { %v55_v16 = vld [vmem:[%s2414_s2 + $0x30] sm:$0xff]  ;;  %v56_v17 = vld [vmem:[%s2414_s2 + $0x38] sm:$0xff]  ;;  %v53_v19 = vld [vmem:[%s2414_s2 + $0x20] sm:$0xff] }
   0x7   :  { %1312 = vmatmul.mubr.msk.bf16.vlgmr.msra.gmra.mxu0 %vm205_vm0, %v1347_v5  ;;  %1320 = vmatmul.mubr.msk.bf16.vlgmr.msra.gmra.mxu1 %vm205_vm0, %v1347_v5  ;;  %v1350_v18 = vld [vmem:[%s2413_s1 + $0x18] sm:$0xff]   ;;  %v54_v20 = vld [vmem:[%s2414_s2 + $0x28] sm:$0xff]  ;;  %v51_v21 = vld [vmem:[%s2414_s2 + $0x10] sm:$0xff] }
   0x8   :  { %272 = vmatprep.mubr.bf16.mxu0 %v2420_v2  ;;  %385 = vmatprep.mubr.bf16.mxu1 %v2420_v2  ;;  %v52_v22 = vld [vmem:[%s2414_s2 + $0x18] sm:$0xff] }
   0x9   :  { %142 = vperm.xlu0 %1339, %v64_v8   ;;  %132 = vperm.xlu1 %1340, %v62_v10  }
   0xd   :  { %117 = vperm.xlu0 %1339, %v59_v11   ;;  %122 = vperm.xlu1 %1340, %v60_v12  }
   0xf   :  { %1313 = vmatmul.mubr.msk.bf16.gmra.mxu0 %vm205_vm0, %v1348_v9  ;;  %1321 = vmatmul.mubr.msk.bf16.gmra.mxu1 %vm205_vm0, %v1348_v9 }
  0x10   :  { %282 = vmatprep.mubr.bf16.mxu0 %v2420_v2  ;;  %395 = vmatprep.mubr.bf16.mxu1 %v2420_v2 }
  0x11   :  { %107 = vperm.xlu0 %1339, %v57_v13   ;;  %112 = vperm.xlu1 %1340, %v58_v15  }
  0x15   :  { %97 = vperm.xlu0 %1339, %v55_v16   ;;  %102 = vperm.xlu1 %1340, %v56_v17  }
  0x17   :  { %1314 = vmatmul.mubr.msk.bf16.gmra.mxu0 %vm205_vm0, %v1349_v14  ;;  %1322 = vmatmul.mubr.msk.bf16.gmra.mxu1 %vm205_vm0, %v1349_v14 }
  0x18   :  { %292 = vmatprep.mubr.bf16.mxu0 %v2420_v2  ;;  %405 = vmatprep.mubr.bf16.mxu1 %v2420_v2 }
  0x19   :  { %87 = vperm.xlu0 %1339, %v53_v19   ;;  %92 = vperm.xlu1 %1340, %v54_v20  }
  0x1f   :  { %1315 = vmatmul.mubr.msk.bf16.gmra.mxu0 %vm205_vm0, %v1350_v18  ;;  %1323 = vmatmul.mubr.msk.bf16.gmra.mxu1 %vm205_vm0, %v1350_v18 }
  0x20   :  { %302 = vmatprep.mubr.bf16.mxu0 %v2420_v2  ;;  %415 = vmatprep.mubr.bf16.mxu1 %v2420_v2 }
  0x21   :  { %13 = vsyncpa [#allocation4], 0  ;;  %77 = vperm.xlu0 %1339, %v51_v21   ;;  %v49_v23 = vld [vmem:[%s2414_s2] sm:$0xff]  ;;  %82 = vperm.xlu1 %1340, %v52_v22   ;;  %v50_v25 = vld [vmem:[%s2414_s2 + $0x8] sm:$0xff]  ;;  %s1643_s10 = smov [#allocation3]  }
  0x22   :  { %v1351_v24 = vld [vmem:[%s2413_s1 + $0x20] sm:$0xff]   ;;  %v569_v27 = vld [vmem:[%s2416_s4 + $0x8] sm:$0xff]  ;;  %v570_v28 = vld [vmem:[%s2416_s4 + $0x10] sm:$0xff] }
  0x23   :  { %v568_v26 = vld [vmem:[%s2416_s4] sm:$0xff]  ;;  %v1352_v29 = vld [vmem:[%s2413_s1 + $0x28] sm:$0xff]   ;;  %v571_v30 = vld [vmem:[%s2416_s4 + $0x18] sm:$0xff] }
  0x24   :  { %v572_v31 = vld [vmem:[%s2416_s4 + $0x20] sm:$0xff]  ;;  %v573_v32 = vld [vmem:[%s2416_s4 + $0x28] sm:$0xff]  ;;  %v574_v33 = vld [vmem:[%s2416_s4 + $0x30] sm:$0xff] }
  0x25   :  { %67 = vperm.xlu0 %1339, %v49_v23   ;;  %72 = vperm.xlu1 %1340, %v50_v25   ;;  %v1353_v34 = vld [vmem:[%s2413_s1 + $0x30] sm:$0xff]   ;;  %v575_v35 = vld [vmem:[%s2416_s4 + $0x38] sm:$0xff]  ;;  %v576_v36 = vld [vmem:[%s2416_s4 + $0x40] sm:$0xff] }
  0x26   :  { %v577_v37 = vld [vmem:[%s2416_s4 + $0x48] sm:$0xff]  ;;  %v1002_v38 = vld [vmem:[%s2417_s5] sm:$0xff]  ;;  %v1354_v39 = vld [vmem:[%s2413_s1 + $0x38] sm:$0xff]  }
  0x27   :  { %1316 = vmatmul.mubr.msk.bf16.gmra.mxu0 %vm205_vm0, %v1351_v24  ;;  %1324 = vmatmul.mubr.msk.bf16.gmra.mxu1 %vm205_vm0, %v1351_v24  ;;  %v1003_v40 = vld [vmem:[%s2417_s5 + $0x8] sm:$0xff]  ;;  %v578_v41 = vld [vmem:[%s2416_s4 + $0x50] sm:$0xff]  ;;  %v579_v43 = vld [vmem:[%s2416_s4 + $0x58] sm:$0xff] }
  0x28   :  { %312 = vmatprep.mubr.bf16.mxu0 %v2420_v2  ;;  %425 = vmatprep.mubr.bf16.mxu1 %v2420_v2  ;;  %v1004_v42 = vld [vmem:[%s2417_s5 + $0x10] sm:$0xff]  ;;  %v1005_v44 = vld [vmem:[%s2417_s5 + $0x18] sm:$0xff]  ;;  %v580_v45 = vld [vmem:[%s2416_s4 + $0x60] sm:$0xff] }
  0x29   :  { %586 = vperm.xlu0 %1339, %v568_v26   ;;  %591 = vperm.xlu1 %1340, %v569_v27   ;;  %v1006_v46 = vld [vmem:[%s2417_s5 + $0x20] sm:$0xff]  ;;  %v581_v47 = vld [vmem:[%s2416_s4 + $0x68] sm:$0xff]  ;;  %v582_v49 = vld [vmem:[%s2416_s4 + $0x70] sm:$0xff] }
  0x2a   :  { %v1007_v48 = vld [vmem:[%s2417_s5 + $0x28] sm:$0xff]  ;;  %v1008_v50 = vld [vmem:[%s2417_s5 + $0x30] sm:$0xff]  ;;  %v583_v51 = vld [vmem:[%s2416_s4 + $0x78] sm:$0xff]  ;;  %s1292_s4 = sshll.u32 %s1643_s10, 4  ;;  %s1293_s4 = int_to_ptr.vmem [resolvable:$true] %s1292_s4 }
  0x2b   :  { %v1009_v52 = vld [vmem:[%s2417_s5 + $0x38] sm:$0xff]  ;;  %v1010_v53 = vld [vmem:[%s2417_s5 + $0x40] sm:$0xff]  ;;  %v1011_v54 = vld [vmem:[%s2417_s5 + $0x48] sm:$0xff]  ;;  %s1619_s1 = scalar_lea.vmem %s1293_s4, 64  ;;  %p1624_p1 = scmp.lt.s32.totalorder %s1293_s4, %s1293_s4 }
  0x2c   :  { %v1012_v55 = vld [vmem:[%s2417_s5 + $0x50] sm:$0xff]  ;;  %v1013_v56 = vld [vmem:[%s2417_s5 + $0x58] sm:$0xff]  ;;  %v1014_v57 = vld [vmem:[%s2417_s5 + $0x60] sm:$0xff]  ;;  %p1620_p0 = scmp.ne.s32.totalorder %s1293_s4, %s1619_s1  ;;  %p1625_p2 = scmp.lt.s32.totalorder %s1619_s1, %s1619_s1 }
  0x2d   :  { %596 = vperm.xlu0 %1339, %v570_v28   ;;  %601 = vperm.xlu1 %1340, %v571_v30   ;;  %v1015_v58 = vld [vmem:[%s2417_s5 + $0x68] sm:$0xff]  ;;  %v1016_v59 = vld [vmem:[%s2417_s5 + $0x70] sm:$0xff]  ;;  %v1017_v60 = vld [vmem:[%s2417_s5 + $0x78] sm:$0xff] }
  0x2e   :  { %p1626_p3 = por %p1625_p2, %p1624_p1 }
  0x2f   :  { %1317 = vmatmul.mubr.msk.bf16.gmra.mxu0 %vm205_vm0, %v1352_v29  ;;  %1325 = vmatmul.mubr.msk.bf16.gmra.mxu1 %vm205_vm0, %v1352_v29 }
  0x30   :  { %322 = vmatprep.mubr.bf16.mxu0 %v2420_v2  ;;  %435 = vmatprep.mubr.bf16.mxu1 %v2420_v2  ;;  %p1627_p4 = pnand %p1626_p3, %p1620_p0 }
  0x31   :  { %606 = vperm.xlu0 %1339, %v572_v31   ;;  %611 = vperm.xlu1 %1340, %v573_v32  }
  0x35   :  { %616 = vperm.xlu0 %1339, %v574_v33   ;;  %621 = vperm.xlu1 %1340, %v575_v35  }
  0x37   :  { %1318 = vmatmul.mubr.msk.bf16.gmra.mxu0 %vm205_vm0, %v1353_v34  ;;  %1326 = vmatmul.mubr.msk.bf16.gmra.mxu1 %vm205_vm0, %v1353_v34 }
  0x38   :  { %332 = vmatprep.mubr.bf16.mxu0 %v2420_v2  ;;  %445 = vmatprep.mubr.bf16.mxu1 %v2420_v2 }
  0x39   :  { %626 = vperm.xlu0 %1339, %v576_v36   ;;  %631 = vperm.xlu1 %1340, %v577_v37  }
  0x3d   :  { %1020 = vperm.xlu0 %1339, %v1002_v38   ;;  %1025 = vperm.xlu1 %1340, %v1003_v40  }
  0x3f   :  { %1319 = vmatmul.mubr.msk.bf16.gmra.mxu0 %vm205_vm0, %v1354_v39  ;;  %1327 = vmatmul.mubr.msk.bf16.gmra.mxu1 %vm205_vm0, %v1354_v39 }
  0x40   :  { %744 = vmatprep.mubr.bf16.mxu0 %v2420_v2  ;;  %857 = vmatprep.mubr.bf16.mxu1 %v2420_v2 }
  0x41   :  { %636 = vperm.xlu0 %1339, %v578_v41   ;;  %1030 = vperm.xlu1 %1340, %v1004_v42  }
  0x45   :  { %641 = vperm.xlu0 %1339, %v579_v43   ;;  %1035 = vperm.xlu1 %1340, %v1005_v44  }
  0x49   :  { %646 = vperm.xlu0 %1339, %v580_v45   ;;  %1040 = vperm.xlu1 %1340, %v1006_v46  }
  0x4d   :  { %651 = vperm.xlu0 %1339, %v581_v47   ;;  %1045 = vperm.xlu1 %1340, %v1007_v48  }
  0x51   :  { %656 = vperm.xlu0 %1339, %v582_v49   ;;  %1050 = vperm.xlu1 %1340, %v1008_v50  }
  0x55   :  { %661 = vperm.xlu0 %1339, %v583_v51   ;;  %1055 = vperm.xlu1 %1340, %v1009_v52  }
  0x59   :  { %1060 = vperm.xlu0 %1339, %v1010_v53   ;;  %1065 = vperm.xlu1 %1340, %v1011_v54  }
  0x5d   :  { %1070 = vperm.xlu0 %1339, %v1012_v55   ;;  %1075 = vperm.xlu1 %1340, %v1013_v56  }
  0x61   :  { %1080 = vperm.xlu0 %1339, %v1014_v57   ;;  %1085 = vperm.xlu1 %1340, %v1015_v58  }
  0x65   :  { %1090 = vperm.xlu0 %1339, %v1016_v59   ;;  %1095 = vperm.xlu1 %1340, %v1017_v60  }
  0x80   :  { %v1900_v61 = vpop.permute.xlu0 %137  ;;  %v1902_v62 = vpop.permute.xlu1 %127 }
  0x84   :  { %v1904_v63 = vpop.permute.xlu0 %142  ;;  %v1906_v0 = vpop.permute.xlu1 %132 }
  0x88   :  { %v1908_v1 = vpop.permute.xlu0 %117  ;;  %v1910_v3 = vpop.permute.xlu1 %122 }
  0x8c   :  { %v1912_v4 = vpop.permute.xlu0 %107  ;;  %v1914_v5 = vpop.permute.xlu1 %112 }
  0x90   :  { %v1916_v6 = vpop.permute.xlu0 %97  ;;  %v1918_v7 = vpop.permute.xlu1 %102 }
  0x94   :  { %v1920_v8 = vpop.permute.xlu0 %87  ;;  %v1922_v9 = vpop.permute.xlu1 %92 }
  0x9c   :  { %v78_v10 = vpop.permute.xlu0 %77  ;;  %v83_v11 = vpop.permute.xlu1 %82 }
  0xa0   :  { %v68_v12 = vpop.permute.xlu0 %67  ;;  %v73_v19 = vpop.permute.xlu1 %72 }
  0xc7   :  { %v264_v13 = vpop.f32.mrf.mxu0  ;;  %v377_v14 = vpop.f32.mrf.mxu1 }
  0xc8   :  { %v265_v15 = vadd.f32 %v264_v13, %v68_v12  ;;  %v378_v16 = vadd.f32 %v377_v14, %v68_v12 }
  0xc9   :  { %v266_v17 = vpop.f32.mrf.mxu0  ;;  %v379_v18 = vpop.f32.mrf.mxu1 }
  0xca   :  { %1363 = vtanh.f32 %v265_v15  ;;  %v267_v20 = vadd.f32 %v266_v17, %v68_v12  ;;  %v380_v21 = vadd.f32 %v379_v18, %v68_v12 }
  0xcb   :  { %1365 = vtanh.f32 %v378_v16  ;;  %v268_v22 = vpop.f32.mrf.mxu0  ;;  %v381_v23 = vpop.f32.mrf.mxu1 }
  0xcc   :  { %1367 = vtanh.f32 %v267_v20  ;;  %v269_v24 = vadd.f32 %v268_v22, %v73_v19  ;;  %v382_v25 = vadd.f32 %v381_v23, %v73_v19 }
  0xcd   :  { %1369 = vtanh.f32 %v380_v21  ;;  %v270_v26 = vpop.f32.mrf.mxu0  ;;  %v383_v27 = vpop.f32.mrf.mxu1 }
  0xce   :  { %1371 = vtanh.f32 %v269_v24  ;;  %v271_v28 = vadd.f32 %v270_v26, %v73_v19  ;;  %v384_v29 = vadd.f32 %v383_v27, %v73_v19 }
  0xcf   :  { %1373 = vtanh.f32 %v382_v25  ;;  %v274_v30 = vpop.f32.mrf.mxu0  ;;  %v387_v31 = vpop.f32.mrf.mxu1 }
  0xd0   :  { %1375 = vtanh.f32 %v271_v28  ;;  %v275_v32 = vadd.f32 %v274_v30, %v78_v10  ;;  %v388_v33 = vadd.f32 %v387_v31, %v78_v10 }
  0xd1   :  { %1377 = vtanh.f32 %v384_v29  ;;  %v276_v34 = vpop.f32.mrf.mxu0  ;;  %v389_v35 = vpop.f32.mrf.mxu1 }
  0xd2   :  { %1379 = vtanh.f32 %v275_v32  ;;  %v277_v36 = vadd.f32 %v276_v34, %v78_v10  ;;  %v390_v37 = vadd.f32 %v389_v35, %v78_v10 }
  0xd3   :  { %1381 = vtanh.f32 %v388_v33  ;;  %v278_v38 = vpop.f32.mrf.mxu0  ;;  %v391_v39 = vpop.f32.mrf.mxu1 }
  0xd4   :  { %1383 = vtanh.f32 %v277_v36  ;;  %v279_v40 = vadd.f32 %v278_v38, %v83_v11  ;;  %v392_v41 = vadd.f32 %v391_v39, %v83_v11 }
  0xd5   :  { %1385 = vtanh.f32 %v390_v37  ;;  %v280_v42 = vpop.f32.mrf.mxu0  ;;  %v393_v43 = vpop.f32.mrf.mxu1 }
  0xd6   :  { %1387 = vtanh.f32 %v279_v40  ;;  %v281_v44 = vadd.f32 %v280_v42, %v83_v11  ;;  %v394_v45 = vadd.f32 %v393_v43, %v83_v11 }
  0xd7   :  { %v1924_v46 = vpop.eup %1363  ;;  %1389 = vtanh.f32 %v392_v41  ;;  %v1926_v47 = vpop.f32.mrf.mxu0 }
  0xd8   :  { %2430 = vst [vmem:[#allocation6_spill] sm:$0xff] %v1924_v46  ;;  %v1928_v48 = vpop.f32.mrf.mxu1  ;;  %v1930_v49 = vpop.eup %1365  ;;  %1391 = vtanh.f32 %v281_v44 }
  0xd9   :  { %2431 = vst [vmem:[#allocation7_spill] sm:$0xff] %v1930_v49  ;;  %v1932_v50 = vpop.eup %1367  ;;  %1393 = vtanh.f32 %v394_v45  ;;  %v286_v51 = vpop.f32.mrf.mxu0 }
  0xda   :  { %2432 = vst [vmem:[#allocation8_spill] sm:$0xff] %v1932_v50  ;;  %v399_v52 = vpop.f32.mrf.mxu1  ;;  %v1934_v53 = vpop.eup %1369  ;;  %v287_v39 = vadd.f32 %v286_v51, %v1920_v8 }
  0xdb   :  { %2433 = vst [vmem:[#allocation9_spill] sm:$0xff] %v1934_v53  ;;  %v1936_v54 = vpop.eup %1371  ;;  %v1938_v55 = vpop.f32.mrf.mxu0  ;;  %v400_v42 = vadd.f32 %v399_v52, %v1920_v8 }
  0xdc   :  { %2434 = vst [vmem:[#allocation10_spill] sm:$0xff] %v1936_v54  ;;  %v1940_v56 = vpop.f32.mrf.mxu1  ;;  %v1942_v57 = vpop.eup %1373  ;;  %1395 = vtanh.f32 %v287_v39 }
  0xdd   :  { %2435 = vst [vmem:[#allocation11_spill] sm:$0xff] %v1942_v57  ;;  %v1946_v59 = vpop.eup %1375  ;;  %v290_v60 = vpop.f32.mrf.mxu0  ;;  %1397 = vtanh.f32 %v400_v42 }
  0xde   :  { %2436 = vst [vmem:[#allocation12_spill] sm:$0xff] %v1946_v59  ;;  %v403_v10 = vpop.f32.mrf.mxu1  ;;  %v1950_v12 = vpop.eup %1377  ;;  %v291_v43 = vadd.f32 %v290_v60, %v1922_v9 }
  0xdf   :  { %2437 = vst [vmem:[#allocation13_spill] sm:$0xff] %v1950_v12  ;;  %v1954_v14 = vpop.eup %1379  ;;  %v1956_v15 = vpop.f32.mrf.mxu0  ;;  %v404_v2 = vadd.f32 %v403_v10, %v1922_v9 }
  0xe0   :  { %v1958_v16 = vpop.f32.mrf.mxu1  ;;  %v1962_v18 = vpop.eup %1381  ;;  %1399 = vtanh.f32 %v291_v43 }
  0xe1   :  { %v1964_v19 = vpop.eup %1383  ;;  %v296_v20 = vpop.f32.mrf.mxu0  ;;  %1401 = vtanh.f32 %v404_v2 }
  0xe2   :  { %v409_v21 = vpop.f32.mrf.mxu1  ;;  %v1966_v22 = vpop.eup %1385  ;;  %v297_v11 = vadd.f32 %v296_v20, %v1916_v6 }
  0xe3   :  { %v1968_v23 = vpop.eup %1387  ;;  %v1970_v24 = vpop.f32.mrf.mxu0  ;;  %v410_v51 = vadd.f32 %v409_v21, %v1916_v6 }
  0xe4   :  { %v1972_v25 = vpop.f32.mrf.mxu1  ;;  %v1974_v26 = vpop.eup %1389  ;;  %1403 = vtanh.f32 %v297_v11 }
  0xe5   :  { %v1978_v28 = vpop.eup %1391  ;;  %v300_v29 = vpop.f32.mrf.mxu0  ;;  %1405 = vtanh.f32 %v410_v51 }
  0xe6   :  { %v413_v30 = vpop.f32.mrf.mxu1  ;;  %v1982_v32 = vpop.eup %1393  ;;  %v301_v13 = vadd.f32 %v300_v29, %v1918_v7 }
  0xe7   :  { %v1986_v34 = vpop.f32.mrf.mxu0  ;;  %v414_v60 = vadd.f32 %v413_v30, %v1918_v7 }
  0xe8   :  { %v1988_v35 = vpop.f32.mrf.mxu1  ;;  %1407 = vtanh.f32 %v301_v13 }
  0xe9   :  { %v306_v37 = vpop.f32.mrf.mxu0  ;;  %1409 = vtanh.f32 %v414_v60  ;;  %v2025_v27 = vpop.eup %1395 }
  0xea   :  { %v419_v38 = vpop.f32.mrf.mxu1  ;;  %v307_v10 = vadd.f32 %v306_v37, %v1912_v4  ;;  %v2028_v36 = vpop.eup %1397 }
  0xeb   :  { %v1993_v40 = vpop.f32.mrf.mxu0  ;;  %v420_v42 = vadd.f32 %v419_v38, %v1912_v4 }
  0xec   :  { %v1995_v41 = vpop.f32.mrf.mxu1  ;;  %1411 = vtanh.f32 %v307_v10 }
  0xed   :  { %v310_v44 = vpop.f32.mrf.mxu0  ;;  %1413 = vtanh.f32 %v420_v42 }
  0xee   :  { %v423_v45 = vpop.f32.mrf.mxu1  ;;  %v311_v21 = vadd.f32 %v310_v44, %v1914_v5 }
  0xef   :  { %v2001_v58 = vpop.f32.mrf.mxu0  ;;  %v424_v2 = vadd.f32 %v423_v45, %v1914_v5 }
  0xf0   :  { %v2003_v17 = vpop.f32.mrf.mxu1  ;;  %1415 = vtanh.f32 %v311_v21 }
  0xf1   :  { %v316_v52 = vpop.f32.mrf.mxu0  ;;  %1417 = vtanh.f32 %v424_v2 }
  0xf2   :  { %v429_v31 = vpop.f32.mrf.mxu1  ;;  %v317_v11 = vadd.f32 %v316_v52, %v1908_v1 }
  0xf3   :  { %v2009_v39 = vpop.f32.mrf.mxu0  ;;  %v430_v51 = vadd.f32 %v429_v31, %v1908_v1 }
  0xf4   :  { %v2011_v20 = vpop.f32.mrf.mxu1  ;;  %1419 = vtanh.f32 %v317_v11 }
  0xf5   :  { %v320_v43 = vpop.f32.mrf.mxu0  ;;  %1421 = vtanh.f32 %v430_v51 }
  0xf6   :  { %v433_v29 = vpop.f32.mrf.mxu1  ;;  %v321_v13 = vadd.f32 %v320_v43, %v1910_v3  ;;  %v2030_v43 = vpop.eup %1399 }
  0xf7   :  { %v2017_v30 = vpop.f32.mrf.mxu0  ;;  %v434_v60 = vadd.f32 %v433_v29, %v1910_v3  ;;  %v2034_v11 = vpop.eup %1401 }
  0xf8   :  { %v2019_v37 = vpop.f32.mrf.mxu1  ;;  %1423 = vtanh.f32 %v321_v13  ;;  %v2036_v51 = vpop.eup %1403 }
  0xf9   :  { %v326_v38 = vpop.f32.mrf.mxu0  ;;  %1425 = vtanh.f32 %v434_v60  ;;  %v2039_v13 = vpop.eup %1405 }
  0xfa   :  { %v439_v44 = vpop.f32.mrf.mxu1  ;;  %v327_v45 = vadd.f32 %v326_v38, %v1902_v62  ;;  %v2041_v60 = vpop.eup %1407 }
  0xfb   :  { %v328_v10 = vpop.f32.mrf.mxu0  ;;  %v440_v42 = vadd.f32 %v439_v44, %v1902_v62 }
  0xfc   :  { %v441_v52 = vpop.f32.mrf.mxu1  ;;  %1427 = vtanh.f32 %v327_v45  ;;  %v2045_v45 = vpop.eup %1409 }
  0xfd   :  { %v330_v31 = vpop.f32.mrf.mxu0  ;;  %1429 = vtanh.f32 %v440_v42  ;;  %v2047_v42 = vpop.eup %1411 }
  0xfe   :  { %v443_v21 = vpop.f32.mrf.mxu1  ;;  %v331_v29 = vadd.f32 %v330_v31, %v1906_v0  ;;  %v2051_v53 = vpop.eup %1413 }
  0xff   :  { %v444_v2 = vadd.f32 %v443_v21, %v1906_v0  ;;  %v334_v38 = vpop.f32.mrf.mxu0 }
 0x100   :  { %v447_v33 = vpop.f32.mrf.mxu1  ;;  %v335_v44 = vadd.f32 %v334_v38, %v1900_v61  ;;  %1431 = vtanh.f32 %v331_v29 }
 0x101   :  { %v336_v49 = vpop.f32.mrf.mxu0  ;;  %1433 = vtanh.f32 %v444_v2 }
 0x102   :  { %v449_v57 = vpop.f32.mrf.mxu1  ;;  %v337_v31 = vadd.f32 %v336_v49, %v1900_v61  ;;  %1435 = vtanh.f32 %v335_v44  ;;  %v2053_v49 = vpop.eup %1415 }
 0x103   :  { %v450_v21 = vadd.f32 %v449_v57, %v1900_v61  ;;  %v338_v46 = vpop.f32.mrf.mxu0  ;;  %v448_v57 = vadd.f32 %v447_v33, %v1900_v61  ;;  %v2058_v59 = vpop.eup %1417  ;;  %v325_v61 = vadd.f32 %v2017_v30, %v1902_v62 }
 0x104   :  { %v451_v54 = vpop.f32.mrf.mxu1  ;;  %1437 = vtanh.f32 %v337_v31  ;;  %v339_v38 = vadd.f32 %v338_v46, %v1904_v63  ;;  %v329_v46 = vadd.f32 %v328_v10, %v1906_v0  ;;  %v442_v31 = vadd.f32 %v441_v52, %v1906_v0 }
 0x105   :  { %v452_v29 = vadd.f32 %v451_v54, %v1904_v63  ;;  %1439 = vtanh.f32 %v450_v21  ;;  %v340_v2 = vpop.f32.mrf.mxu0  ;;  %v2061_v54 = vpop.eup %1419  ;;  %v319_v10 = vadd.f32 %v2009_v39, %v1910_v3  ;;  %v432_v52 = vadd.f32 %v2011_v20, %v1910_v3 }
 0x106   :  { %v453_v12 = vpop.f32.mrf.mxu1  ;;  %1441 = vtanh.f32 %v339_v38  ;;  %v341_v44 = vadd.f32 %v340_v2, %v1904_v63  ;;  %v2064_v21 = vpop.eup %1421  ;;  %v309_v39 = vadd.f32 %v1993_v40, %v1914_v5  ;;  %v422_v3 = vadd.f32 %v1995_v41, %v1914_v5 }
 0x107   :  { %v454_v50 = vadd.f32 %v453_v12, %v1904_v63  ;;  %1443 = vtanh.f32 %v452_v29  ;;  %v2068_v33 = vpop.eup %1423  ;;  %v438_v63 = vadd.f32 %v2019_v37, %v1902_v62  ;;  %v428_v62 = vadd.f32 %v2003_v17, %v1908_v1 }
 0x108   :  { %1445 = vtanh.f32 %v341_v44  ;;  %v2072_v12 = vpop.eup %1425  ;;  %v299_v40 = vadd.f32 %v1970_v24, %v1918_v7  ;;  %v412_v5 = vadd.f32 %v1972_v25, %v1918_v7  ;;  %v289_v24 = vadd.f32 %v1938_v55, %v1922_v9 }
 0x109   :  { %1447 = vtanh.f32 %v454_v50  ;;  %v1428_v0 = vpop.eup %1427  ;;  %v315_v50 = vadd.f32 %v2001_v58, %v1908_v1  ;;  %v305_v58 = vadd.f32 %v1986_v34, %v1912_v4  ;;  %v418_v1 = vadd.f32 %v1988_v35, %v1912_v4 }
 0x10a   :  { %1449 = vtanh.f32 %v448_v57  ;;  %v1430_v38 = vpop.eup %1429  ;;  %v295_v34 = vadd.f32 %v1956_v15, %v1916_v6  ;;  %v408_v4 = vadd.f32 %v1958_v16, %v1916_v6  ;;  %v402_v25 = vadd.f32 %v1940_v56, %v1922_v9 }
 0x10b   :  { %1451 = vtanh.f32 %v329_v46  ;;  %v285_v6 = vadd.f32 %v1926_v47, %v1920_v8  ;;  %v557_v47 = vpack.c.bf16 %v2068_v33, %v2061_v54  ;;  %v555_v54 = vpack.c.bf16 %v2058_v59, %v2051_v53 }
 0x10c   :  { %1453 = vtanh.f32 %v442_v31 }
 0x10d   :  { %1455 = vtanh.f32 %v325_v61  ;;  %v1432_v30 = vpop.eup %1431 }
 0x10e   :  { %1457 = vtanh.f32 %v438_v63  ;;  %v1434_v37 = vpop.eup %1433  ;;  %v561_v63 = vpack.c.bf16 %v1432_v30, %v1428_v0 }
 0x10f   :  { %1459 = vtanh.f32 %v319_v10  ;;  %v1436_v29 = vpop.eup %1435  ;;  %v563_v16 = vpack.c.bf16 %v1434_v37, %v1430_v38  ;;  %v559_v38 = vpack.c.bf16 %v2072_v12, %v2064_v21 }
 0x110   :  { %1461 = vtanh.f32 %v432_v52  ;;  %v398_v52 = vadd.f32 %v1928_v48, %v1920_v8 }
 0x111   :  { %v1438_v20 = vpop.eup %1437  ;;  %1463 = vtanh.f32 %v315_v50 }
 0x112   :  { %v1440_v2 = vpop.eup %1439  ;;  %1465 = vtanh.f32 %v428_v62 }
 0x113   :  { %v1442_v17 = vpop.eup %1441  ;;  %1467 = vtanh.f32 %v309_v39 }
 0x114   :  { %v1444_v57 = vpop.eup %1443  ;;  %1469 = vtanh.f32 %v422_v3  ;;  %v564_v61 = vpack.c.bf16 %v1442_v17, %v1436_v29  ;;  %v553_v29 = vpack.c.bf16 %v2053_v49, %v2047_v42  ;;  %v551_v42 = vpack.c.bf16 %v2045_v45, %v2039_v13 }
 0x115   :  { %v1446_v41 = vpop.eup %1445  ;;  %1471 = vtanh.f32 %v305_v58 }
 0x116   :  { %v1448_v44 = vpop.eup %1447  ;;  %1473 = vtanh.f32 %v418_v1  ;;  %v565_v35 = vpack.c.bf16 %v1446_v41, %v1438_v20 }
 0x117   :  { %v1450_v46 = vpop.eup %1449  ;;  %1475 = vtanh.f32 %v299_v40  ;;  %v567_v31 = vpack.c.bf16 %v1448_v44, %v1440_v2  ;;  %v549_v2 = vpack.c.bf16 %v2041_v60, %v2036_v51  ;;  %v547_v51 = vpack.c.bf16 %v2034_v11, %v2028_v36  ;;  %v2442_v11 = vld [vmem:[#allocation12_spill] sm:$0xff] }
 0x118   :  { %v1452_v7 = vpop.eup %1451  ;;  %1477 = vtanh.f32 %v412_v5  ;;  %712 = vmatprep.subr.bf16.mxu0 %v565_v35  ;;  %v566_v15 = vpack.c.bf16 %v1444_v57, %v1450_v46  ;;  %v545_v57 = vpack.c.bf16 %v2030_v43, %v2025_v27  ;;  %v2439_v27 = vpack.c.bf16 %v1982_v32, %v1966_v22  ;;  %v2443_v44 = vld [vmem:[#allocation8_spill] sm:$0xff]  ;;  %v2445_v35 = vld [vmem:[#allocation13_spill] sm:$0xff]  ;;  %v2449_v32 = vld [vmem:[#allocation6_spill] sm:$0xff] }
 0x119   :  { %v1454_v10 = vpop.eup %1453  ;;  %1479 = vtanh.f32 %v295_v34  ;;  %825 = vmatprep.subr.bf16.mxu1 %v567_v31  ;;  %713 = vmatpush1.bf16.msra.mxu0 %v564_v61  ;;  %v2438_v34 = vpack.c.bf16 %v1978_v28, %v1964_v19  ;;  %v2440_v36 = vpack.c.bf16 %v1968_v23, %v1954_v14  ;;  %v2441_v43 = vpack.c.bf16 %v1974_v26, %v1962_v18  ;;  %v2446_v46 = vld [vmem:[#allocation9_spill] sm:$0xff]  ;;  %v2448_v28 = vld [vmem:[#allocation10_spill] sm:$0xff]  ;;  %v2451_v23 = vld [vmem:[#allocation11_spill] sm:$0xff] }
 0x11a   :  { %v1456_v55 = vpop.eup %1455  ;;  %1481 = vtanh.f32 %v408_v4  ;;  %826 = vmatpush1.bf16.msra.mxu1 %v566_v15  ;;  %714 = vmatprep.subr.bf16.mxu0 %v561_v63  ;;  %v2444_v4 = vpack.c.bf16 %v2442_v11, %v2443_v44  ;;  %v2447_v19 = vpack.c.bf16 %v2445_v35, %v2446_v46  ;;  %v1355_v22 = vld [vmem:[%s2415_s3] sm:$0xff]   ;;  %v2450_v14 = vpack.c.bf16 %v2448_v28, %v2449_v32  ;;  %v1356_v31 = vld [vmem:[%s2415_s3 + $0x8] sm:$0xff]   ;;  %v1357_v61 = vld [vmem:[%s2415_s3 + $0x10] sm:$0xff]  }
 0x11b   :  { %v1458_v9 = vpop.eup %1457  ;;  %1483 = vtanh.f32 %v289_v24  ;;  %827 = vmatprep.subr.bf16.mxu1 %v563_v16  ;;  %v560_v56 = vpack.c.bf16 %v1452_v7, %v1456_v55  ;;  %v2452_v24 = vld [vmem:[#allocation7_spill] sm:$0xff]  ;;  %v2454_v26 = vmov 0   ;;  %v1358_v7 = vld [vmem:[%s2415_s3 + $0x18] sm:$0xff]   ;;  %v592_v16 = vpop.permute.xlu1 %591 }
 0x11c   :  { %v1460_v0 = vpop.eup %1459  ;;  %1485 = vtanh.f32 %v402_v25  ;;  %v562_v50 = vpack.c.bf16 %v1454_v10, %v1458_v9  ;;  %v2453_v18 = vpack.c.bf16 %v2451_v23, %v2452_v24  ;;  %v1359_v25 = vld [vmem:[%s2415_s3 + $0x20] sm:$0xff]   ;;  %v1360_v15 = vld [vmem:[%s2415_s3 + $0x28] sm:$0xff]   ;;  %v1361_v63 = vld [vmem:[%s2415_s3 + $0x30] sm:$0xff]  }
 0x11d   :  { %v1462_v30 = vpop.eup %1461  ;;  %1487 = vtanh.f32 %v285_v6  ;;  %715 = vmatpush1.bf16.msra.mxu0 %v560_v56  ;;  %v1362_v10 = vld [vmem:[%s2415_s3 + $0x38] sm:$0xff]   ;;  %v587_v6 = vpop.permute.xlu0 %586 }
 0x11e   :  { %v1464_v8 = vpop.eup %1463  ;;  %1489 = vtanh.f32 %v398_v52  ;;  %828 = vmatpush1.bf16.msra.mxu1 %v562_v50  ;;  %716 = vmatprep.subr.bf16.mxu0 %v557_v47 }
 0x11f   :  { %v1466_v48 = vpop.eup %1465  ;;  %829 = vmatprep.subr.bf16.mxu1 %v559_v38  ;;  %v556_v62 = vpack.c.bf16 %v1460_v0, %v1464_v8  ;;  %v602_v52 = vpop.permute.xlu1 %601 }
 0x120   :  { %v1468_v37 = vpop.eup %1467  ;;  %v558_v39 = vpack.c.bf16 %v1462_v30, %v1466_v48 }
 0x121   :  { %v1470_v3 = vpop.eup %1469  ;;  %717 = vmatpush1.bf16.msra.mxu0 %v556_v62  ;;  %v597_v55 = vpop.permute.xlu0 %596 }
 0x122   :  { %v1472_v33 = vpop.eup %1471  ;;  %830 = vmatpush1.bf16.msra.mxu1 %v558_v39  ;;  %718 = vmatprep.subr.bf16.mxu0 %v553_v29 }
 0x123   :  { %v1474_v21 = vpop.eup %1473  ;;  %831 = vmatprep.subr.bf16.mxu1 %v555_v54  ;;  %v552_v12 = vpack.c.bf16 %v1468_v37, %v1472_v33  ;;  %v2186_v56 = vpop.permute.xlu1 %611 }
 0x124   :  { %v1476_v20 = vpop.eup %1475  ;;  %v554_v58 = vpack.c.bf16 %v1470_v3, %v1474_v21 }
 0x125   :  { %v1478_v1 = vpop.eup %1477  ;;  %719 = vmatpush1.bf16.msra.mxu0 %v552_v12  ;;  %v2184_v9 = vpop.permute.xlu0 %606 }
 0x126   :  { %v1480_v49 = vpop.eup %1479  ;;  %832 = vmatpush1.bf16.msra.mxu1 %v554_v58  ;;  %720 = vmatprep.subr.bf16.mxu0 %v549_v2 }
 0x127   :  { %v1482_v53 = vpop.eup %1481  ;;  %833 = vmatprep.subr.bf16.mxu1 %v551_v42  ;;  %v548_v59 = vpack.c.bf16 %v1476_v20, %v1480_v49  ;;  %v2190_v37 = vpop.permute.xlu1 %621 }
 0x128   :  { %v1484_v17 = vpop.eup %1483  ;;  %v550_v40 = vpack.c.bf16 %v1478_v1, %v1482_v53 }
 0x129   :  { %v1486_v5 = vpop.eup %1485  ;;  %721 = vmatpush1.bf16.msra.mxu0 %v548_v59  ;;  %v2188_v0 = vpop.permute.xlu0 %616 }
 0x12a   :  { %v1488_v60 = vpop.eup %1487  ;;  %834 = vmatpush1.bf16.msra.mxu1 %v550_v40  ;;  %722 = vmatprep.subr.bf16.mxu0 %v545_v57 }
 0x12b   :  { %v1490_v13 = vpop.eup %1489  ;;  %835 = vmatprep.subr.bf16.mxu1 %v547_v51  ;;  %v544_v45 = vpack.c.bf16 %v1484_v17, %v1488_v60  ;;  %v2194_v53 = vpop.permute.xlu1 %631 }
 0x12c   :  { %v546_v41 = vpack.c.bf16 %v1486_v5, %v1490_v13 }
 0x12d   :  { %723 = vmatpush1.bf16.msra.mxu0 %v544_v45  ;;  %v2192_v33 = vpop.permute.xlu0 %626 }
 0x12e   :  { %836 = vmatpush1.bf16.msra.mxu1 %v546_v41  ;;  %724 = vmatprep.subr.bf16.mxu0 %v2438_v34 }
 0x12f   :  { %837 = vmatprep.subr.bf16.mxu1 %v2439_v27  ;;  %v2200_v11 = vpop.permute.xlu1 %1025 }
 0x131   :  { %725 = vmatpush1.bf16.msra.mxu0 %v2440_v36  ;;  %v2196_v5 = vpop.permute.xlu0 %1020 }
 0x132   :  { %838 = vmatpush1.bf16.msra.mxu1 %v2441_v43  ;;  %726 = vmatprep.subr.bf16.mxu0 %v2444_v4 }
 0x133   :  { %839 = vmatprep.subr.bf16.mxu1 %v2447_v19 }
 0x135   :  { %727 = vmatpush1.bf16.msra.mxu0 %v2450_v14  ;;  %v2207_v28 = vpop.permute.xlu0 %636 }
 0x136   :  { %840 = vmatpush1.bf16.msra.mxu1 %v2453_v18 }
 0x138   :  { %745 = vmatmul.mubr.bf16.vlgmr.msra.gmra.mxu0 %v1355_v22 }
 0x139   :  { %858 = vmatmul.mubr.bf16.vlgmr.msra.gmra.mxu1 %v1355_v22  ;;  %754 = vmatprep.mubr.bf16.mxu0 %v2454_v26 }
 0x13a   :  { %867 = vmatprep.mubr.bf16.mxu1 %v2454_v26 }
 0x140   :  { %755 = vmatmul.mubr.bf16.gmra.mxu0 %v1356_v31 }
 0x141   :  { %868 = vmatmul.mubr.bf16.gmra.mxu1 %v1356_v31  ;;  %764 = vmatprep.mubr.bf16.mxu0 %v2454_v26 }
 0x142   :  { %877 = vmatprep.mubr.bf16.mxu1 %v2454_v26 }
 0x148   :  { %765 = vmatmul.mubr.bf16.gmra.mxu0 %v1357_v61 }
 0x149   :  { %878 = vmatmul.mubr.bf16.gmra.mxu1 %v1357_v61  ;;  %774 = vmatprep.mubr.bf16.mxu0 %v2454_v26 }
 0x14a   :  { %887 = vmatprep.mubr.bf16.mxu1 %v2454_v26 }
 0x150   :  { %775 = vmatmul.mubr.bf16.gmra.mxu0 %v1358_v7 }
 0x151   :  { %888 = vmatmul.mubr.bf16.gmra.mxu1 %v1358_v7  ;;  %784 = vmatprep.mubr.bf16.mxu0 %v2454_v26 }
 0x152   :  { %897 = vmatprep.mubr.bf16.mxu1 %v2454_v26 }
 0x158   :  { %785 = vmatmul.mubr.bf16.gmra.mxu0 %v1359_v25 }
 0x159   :  { %898 = vmatmul.mubr.bf16.gmra.mxu1 %v1359_v25  ;;  %794 = vmatprep.mubr.bf16.mxu0 %v2454_v26 }
 0x15a   :  { %907 = vmatprep.mubr.bf16.mxu1 %v2454_v26 }
 0x160   :  { %795 = vmatmul.mubr.bf16.gmra.mxu0 %v1360_v15 }
 0x161   :  { %908 = vmatmul.mubr.bf16.gmra.mxu1 %v1360_v15  ;;  %804 = vmatprep.mubr.bf16.mxu0 %v2454_v26 }
 0x162   :  { %917 = vmatprep.mubr.bf16.mxu1 %v2454_v26 }
 0x168   :  { %805 = vmatmul.mubr.bf16.gmra.mxu0 %v1361_v63 }
 0x169   :  { %918 = vmatmul.mubr.bf16.gmra.mxu1 %v1361_v63  ;;  %814 = vmatprep.mubr.bf16.mxu0 %v2454_v26 }
 0x16a   :  { %927 = vmatprep.mubr.bf16.mxu1 %v2454_v26 }
 0x170   :  { %815 = vmatmul.mubr.bf16.gmra.mxu0 %v1362_v10 }
 0x171   :  { %928 = vmatmul.mubr.bf16.gmra.mxu1 %v1362_v10  ;;  %v2215_v10 = vpop.permute.xlu1 %1030 }
 0x1f8   :  { %v746_v50 = vpop.f32.mrf.mxu0 }
 0x1f9   :  { %v747_v47 = vadd.f32 %v746_v50, %v587_v6  ;;  %v859_v30 = vpop.f32.mrf.mxu1 }
 0x1fa   :  { %v860_v38 = vadd.f32 %v859_v30, %v587_v6  ;;  %v748_v8 = vpop.f32.mrf.mxu0 }
 0x1fb   :  { %1491 = vtanh.f32 %v747_v47  ;;  %v749_v48 = vadd.f32 %v748_v8, %v587_v6  ;;  %v861_v62 = vpop.f32.mrf.mxu1 }
 0x1fc   :  { %1493 = vtanh.f32 %v860_v38  ;;  %v862_v39 = vadd.f32 %v861_v62, %v587_v6  ;;  %v750_v29 = vpop.f32.mrf.mxu0 }
 0x1fd   :  { %1495 = vtanh.f32 %v749_v48  ;;  %v751_v3 = vadd.f32 %v750_v29, %v592_v16  ;;  %v863_v54 = vpop.f32.mrf.mxu1 }
 0x1fe   :  { %1497 = vtanh.f32 %v862_v39  ;;  %v864_v21 = vadd.f32 %v863_v54, %v592_v16  ;;  %v752_v12 = vpop.f32.mrf.mxu0 }
 0x1ff   :  { %1499 = vtanh.f32 %v751_v3  ;;  %v753_v20 = vadd.f32 %v752_v12, %v592_v16  ;;  %v865_v58 = vpop.f32.mrf.mxu1 }
 0x200   :  { %1501 = vtanh.f32 %v864_v21  ;;  %v866_v2 = vadd.f32 %v865_v58, %v592_v16  ;;  %v756_v1 = vpop.f32.mrf.mxu0 }
 0x201   :  { %1503 = vtanh.f32 %v753_v20  ;;  %v757_v42 = vadd.f32 %v756_v1, %v597_v55  ;;  %v869_v49 = vpop.f32.mrf.mxu1  ;;  %v2235_v20 = vpop.permute.xlu1 %1035 }
 0x202   :  { %1505 = vtanh.f32 %v866_v2  ;;  %v870_v59 = vadd.f32 %v869_v49, %v597_v55  ;;  %v758_v17 = vpop.f32.mrf.mxu0 }
 0x203   :  { %1507 = vtanh.f32 %v757_v42  ;;  %v759_v40 = vadd.f32 %v758_v17, %v597_v55  ;;  %v871_v57 = vpop.f32.mrf.mxu1 }
 0x204   :  { %1509 = vtanh.f32 %v870_v59  ;;  %v872_v51 = vadd.f32 %v871_v57, %v597_v55  ;;  %v760_v60 = vpop.f32.mrf.mxu0 }
 0x205   :  { %1511 = vtanh.f32 %v759_v40  ;;  %v761_v13 = vadd.f32 %v760_v60, %v602_v52  ;;  %v873_v45 = vpop.f32.mrf.mxu1 }
 0x206   :  { %1513 = vtanh.f32 %v872_v51  ;;  %v874_v41 = vadd.f32 %v873_v45, %v602_v52  ;;  %v762_v34 = vpop.f32.mrf.mxu0 }
 0x207   :  { %1515 = vtanh.f32 %v761_v13  ;;  %v763_v27 = vadd.f32 %v762_v34, %v602_v52  ;;  %v875_v36 = vpop.f32.mrf.mxu1 }
 0x208   :  { %v2198_v43 = vpop.eup %1491  ;;  %1517 = vtanh.f32 %v874_v41  ;;  %v876_v44 = vadd.f32 %v875_v36, %v602_v52  ;;  %v766_v4 = vpop.f32.mrf.mxu0 }
 0x209   :  { %v2202_v35 = vpop.eup %1493  ;;  %1519 = vtanh.f32 %v763_v27  ;;  %v767_v46 = vadd.f32 %v766_v4, %v2184_v9  ;;  %v879_v19 = vpop.f32.mrf.mxu1 }
 0x20a   :  { %v2205_v22 = vpop.eup %1495  ;;  %1521 = vtanh.f32 %v876_v44  ;;  %v880_v32 = vadd.f32 %v879_v19, %v2184_v9  ;;  %v768_v14 = vpop.f32.mrf.mxu0  ;;  %v1098_v44 = vmul.f32 %v2198_v43, %v2196_v5 }
 0x20b   :  { %v2210_v23 = vpop.eup %1497  ;;  %1523 = vtanh.f32 %v767_v46  ;;  %v769_v24 = vadd.f32 %v768_v14, %v2184_v9  ;;  %v881_v18 = vpop.f32.mrf.mxu1 }
 0x20c   :  { %v1500_v26 = vpop.eup %1499  ;;  %1525 = vtanh.f32 %v880_v32  ;;  %v882_v31 = vadd.f32 %v881_v18, %v2184_v9  ;;  %v770_v61 = vpop.f32.mrf.mxu0 }
 0x20d   :  { %v1502_v7 = vpop.eup %1501  ;;  %1527 = vtanh.f32 %v769_v24  ;;  %v771_v25 = vadd.f32 %v770_v61, %v2186_v56  ;;  %v883_v15 = vpop.f32.mrf.mxu1  ;;  %v1102_v45 = vmul.f32 %v1500_v26, %v2200_v11  ;;  %v1100_v24 = vmul.f32 %v2202_v35, %v2196_v5 }
 0x20e   :  { %v1504_v63 = vpop.eup %1503  ;;  %1529 = vtanh.f32 %v882_v31  ;;  %v884_v6 = vadd.f32 %v883_v15, %v2186_v56  ;;  %v772_v16 = vpop.f32.mrf.mxu0  ;;  %v1104_v41 = vmul.f32 %v1502_v7, %v2200_v11  ;;  %v1099_v31 = vmul.f32 %v2205_v22, %v2196_v5 }
 0x20f   :  { %v1506_v55 = vpop.eup %1505  ;;  %1531 = vtanh.f32 %v771_v25  ;;  %v773_v52 = vadd.f32 %v772_v16, %v2186_v56  ;;  %v885_v50 = vpop.f32.mrf.mxu1  ;;  %v1103_v4 = vmul.f32 %v1504_v63, %v2200_v11  ;;  %v1101_v61 = vmul.f32 %v2210_v23, %v2196_v5 }
 0x210   :  { %v2219_v47 = vpop.eup %1507  ;;  %v2221_v9 = vpop.permute.xlu0 %641  ;;  %1533 = vtanh.f32 %v884_v6  ;;  %v886_v30 = vadd.f32 %v885_v50, %v2186_v56  ;;  %v1204_v63 = vadd.f32 %v1104_v41, %v1100_v24 }
 0x211   :  { %v776_v38 = vpop.f32.mrf.mxu0  ;;  %v2224_v8 = vpop.eup %1509  ;;  %1535 = vtanh.f32 %v773_v52  ;;  %v1183_v22 = vadd.f32 %v1103_v4, %v1099_v31  ;;  %v1106_v5 = vmul.f32 %v2219_v47, %v2215_v10 }
 0x212   :  { %v777_v48 = vadd.f32 %v776_v38, %v2188_v0  ;;  %v889_v62 = vpop.f32.mrf.mxu1  ;;  %v2227_v39 = vpop.eup %1511  ;;  %1537 = vtanh.f32 %v886_v30  ;;  %v1108_v38 = vmul.f32 %v2224_v8, %v2215_v10 }
 0x213   :  { %v890_v29 = vadd.f32 %v889_v62, %v2188_v0  ;;  %v778_v3 = vpop.f32.mrf.mxu0  ;;  %v2230_v54 = vpop.eup %1513 }
 0x214   :  { %1539 = vtanh.f32 %v777_v48  ;;  %v779_v21 = vadd.f32 %v778_v3, %v2188_v0  ;;  %v891_v12 = vpop.f32.mrf.mxu1  ;;  %v2233_v56 = vpop.eup %1515  ;;  %v1109_v47 = vmul.f32 %v2230_v54, %v2215_v10 }
 0x215   :  { %1541 = vtanh.f32 %v890_v29  ;;  %v892_v58 = vadd.f32 %v891_v12, %v2188_v0  ;;  %v780_v2 = vpop.f32.mrf.mxu0  ;;  %v2238_v1 = vpop.eup %1517  ;;  %v1107_v29 = vmul.f32 %v2227_v39, %v2215_v10  ;;  %v1110_v8 = vmul.f32 %v2233_v56, %v2235_v20 }
 0x216   :  { %1543 = vtanh.f32 %v779_v21  ;;  %v781_v42 = vadd.f32 %v780_v2, %v2190_v37  ;;  %v893_v49 = vpop.f32.mrf.mxu1  ;;  %v2241_v59 = vpop.eup %1519  ;;  %v1112_v2 = vmul.f32 %v2238_v1, %v2235_v20 }
 0x217   :  { %v2243_v17 = vpop.permute.xlu0 %646  ;;  %1545 = vtanh.f32 %v892_v58  ;;  %v894_v40 = vadd.f32 %v893_v49, %v2190_v37  ;;  %v782_v57 = vpop.f32.mrf.mxu0  ;;  %v1111_v54 = vmul.f32 %v2241_v59, %v2235_v20 }
 0x218   :  { %v2246_v51 = vpop.eup %1521  ;;  %1547 = vtanh.f32 %v781_v42  ;;  %v783_v0 = vadd.f32 %v782_v57, %v2190_v37  ;;  %v895_v60 = vpop.f32.mrf.mxu1 }
 0x219   :  { %v2249_v13 = vpop.eup %1523  ;;  %1549 = vtanh.f32 %v894_v40  ;;  %v896_v34 = vadd.f32 %v895_v60, %v2190_v37  ;;  %v786_v27 = vpop.f32.mrf.mxu0  ;;  %v1105_v37 = vmul.f32 %v1506_v55, %v2200_v11  ;;  %v1162_v11 = vadd.f32 %v1102_v45, %v1098_v44 }
 0x21a   :  { %v2254_v36 = vpop.eup %1525  ;;  %1551 = vtanh.f32 %v783_v0  ;;  %v787_v46 = vadd.f32 %v786_v27, %v2192_v33  ;;  %v899_v19 = vpop.f32.mrf.mxu1  ;;  %v1205_v60 = vadd.f32 %v1204_v63, %v1108_v38  ;;  %v1113_v1 = vmul.f32 %v2246_v51, %v2235_v20 }
 0x21b   :  { %v2260_v32 = vpop.eup %1527  ;;  %v2262_v14 = vpop.permute.xlu1 %1040  ;;  %1553 = vtanh.f32 %v896_v34  ;;  %v900_v18 = vadd.f32 %v899_v19, %v2192_v33  ;;  %v1225_v30 = vadd.f32 %v1105_v37, %v1101_v61  ;;  %v1163_v10 = vadd.f32 %v1162_v11, %v1106_v5 }
 0x21c   :  { %v788_v26 = vpop.f32.mrf.mxu0  ;;  %v2268_v43 = vpop.eup %1529  ;;  %1555 = vtanh.f32 %v787_v46  ;;  %v1184_v34 = vadd.f32 %v1183_v22, %v1107_v29  ;;  %v1206_v19 = vadd.f32 %v1205_v60, %v1112_v2  ;;  %v1116_v11 = vmul.f32 %v2254_v36, %v2262_v14 }
 0x21d   :  { %v789_v7 = vadd.f32 %v788_v26, %v2192_v33  ;;  %v901_v25 = vpop.f32.mrf.mxu1  ;;  %v2275_v15 = vpop.eup %1531  ;;  %1557 = vtanh.f32 %v900_v18  ;;  %v1226_v59 = vadd.f32 %v1225_v30, %v1109_v47  ;;  %v1164_v46 = vadd.f32 %v1163_v10, %v1110_v8 }
 0x21e   :  { %v2277_v35 = vpop.permute.xlu0 %651  ;;  %v902_v6 = vadd.f32 %v901_v25, %v2192_v33  ;;  %v790_v16 = vpop.f32.mrf.mxu0  ;;  %v1185_v37 = vadd.f32 %v1184_v34, %v1111_v54  ;;  %v1114_v18 = vmul.f32 %v2249_v13, %v2262_v14  ;;  %v1115_v13 = vmul.f32 %v2260_v32, %v2262_v14 }
 0x21f   :  { %v2280_v55 = vpop.eup %1533  ;;  %1559 = vtanh.f32 %v789_v7  ;;  %v791_v23 = vadd.f32 %v790_v16, %v2194_v53  ;;  %v903_v52 = vpop.f32.mrf.mxu1  ;;  %v1227_v25 = vadd.f32 %v1226_v59, %v1113_v1  ;;  %v1117_v16 = vmul.f32 %v2268_v43, %v2262_v14 }
 0x220   :  { %v2285_v50 = vpop.eup %1535  ;;  %1561 = vtanh.f32 %v902_v6  ;;  %v904_v33 = vadd.f32 %v903_v52, %v2194_v53  ;;  %v792_v48 = vpop.f32.mrf.mxu0  ;;  %v1165_v14 = vadd.f32 %v1164_v46, %v1114_v18  ;;  %v1186_v8 = vadd.f32 %v1185_v37, %v1115_v13 }
 0x221   :  { %v2290_v62 = vpop.eup %1537  ;;  %1563 = vtanh.f32 %v791_v23  ;;  %v793_v3 = vadd.f32 %v792_v48, %v2194_v53  ;;  %v905_v21 = vpop.f32.mrf.mxu1  ;;  %v1228_v2 = vadd.f32 %v1227_v25, %v1117_v16 }
 0x222   :  { %v2297_v12 = vpop.eup %1539  ;;  %v2299_v58 = vpop.permute.xlu1 %1045  ;;  %1565 = vtanh.f32 %v904_v33  ;;  %v906_v39 = vadd.f32 %v905_v21, %v2194_v53 }
 0x223   :  { %v796_v42 = vpop.f32.mrf.mxu0  ;;  %v2306_v49 = vpop.eup %1541  ;;  %1567 = vtanh.f32 %v793_v3  ;;  %v1118_v36 = vmul.f32 %v2275_v15, %v2299_v58  ;;  %v1120_v30 = vmul.f32 %v2280_v55, %v2299_v58  ;;  %v1119_v43 = vmul.f32 %v2285_v50, %v2299_v58 }
 0x224   :  { %v797_v40 = vadd.f32 %v796_v42, %v2207_v28  ;;  %v909_v57 = vpop.f32.mrf.mxu1  ;;  %v2311_v0 = vpop.eup %1543  ;;  %1569 = vtanh.f32 %v906_v39  ;;  %v1207_v15 = vadd.f32 %v1206_v19, %v1116_v11  ;;  %v1121_v55 = vmul.f32 %v2290_v62, %v2299_v58 }
 0x225   :  { %v2313_v56 = vpop.permute.xlu0 %656  ;;  %v910_v53 = vadd.f32 %v909_v57, %v2207_v28  ;;  %v798_v45 = vpop.f32.mrf.mxu0  ;;  %v1166_v54 = vadd.f32 %v1165_v14, %v1118_v36  ;;  %v1187_v60 = vadd.f32 %v1186_v8, %v1119_v43 }
 0x226   :  { %v2318_v41 = vpop.eup %1545  ;;  %1571 = vtanh.f32 %v797_v40  ;;  %v799_v27 = vadd.f32 %v798_v45, %v2207_v28  ;;  %v911_v44 = vpop.f32.mrf.mxu1  ;;  %v1208_v40 = vadd.f32 %v1207_v15, %v1120_v30 }
 0x227   :  { %v2321_v4 = vpop.eup %1547  ;;  %1573 = vtanh.f32 %v910_v53  ;;  %v912_v24 = vadd.f32 %v911_v44, %v2207_v28  ;;  %v800_v20 = vpop.f32.mrf.mxu0 }
 0x228   :  { %v2324_v51 = vpop.eup %1549  ;;  %1575 = vtanh.f32 %v799_v27  ;;  %v801_v26 = vadd.f32 %v800_v20, %v2221_v9  ;;  %v913_v31 = vpop.f32.mrf.mxu1  ;;  %v1229_v27 = vadd.f32 %v1228_v2, %v1121_v55 }
 0x229   :  { %v2329_v61 = vpop.eup %1551  ;;  %v1051_v7 = vpop.permute.xlu1 %1050  ;;  %1577 = vtanh.f32 %v912_v24  ;;  %v914_v28 = vadd.f32 %v913_v31, %v2221_v9 }
 0x22a   :  { %v802_v63 = vpop.f32.mrf.mxu0  ;;  %v2334_v6 = vpop.eup %1553  ;;  %1579 = vtanh.f32 %v801_v26  ;;  %v1122_v1 = vmul.f32 %v2297_v12, %v1051_v7  ;;  %v1124_v44 = vmul.f32 %v2306_v49, %v1051_v7  ;;  %v1123_v24 = vmul.f32 %v2311_v0, %v1051_v7 }
 0x22b   :  { %v803_v22 = vadd.f32 %v802_v63, %v2221_v9  ;;  %v915_v5 = vpop.f32.mrf.mxu1  ;;  %v2341_v23 = vpop.eup %1555  ;;  %1581 = vtanh.f32 %v914_v28  ;;  %v1125_v12 = vmul.f32 %v2318_v41, %v1051_v7 }
 0x22c   :  { %v2343_v52 = vpop.permute.xlu0 %661  ;;  %v916_v32 = vadd.f32 %v915_v5, %v2221_v9  ;;  %v806_v38 = vpop.f32.mrf.mxu0  ;;  %v1167_v28 = vadd.f32 %v1166_v54, %v1122_v1  ;;  %v1209_v16 = vadd.f32 %v1208_v40, %v1124_v44 }
 0x22d   :  { %v2350_v33 = vpop.eup %1557  ;;  %1583 = vtanh.f32 %v803_v22  ;;  %v807_v48 = vadd.f32 %v806_v38, %v2243_v17  ;;  %v919_v29 = vpop.f32.mrf.mxu1  ;;  %v1230_v36 = vadd.f32 %v1229_v27, %v1125_v12 }
 0x22e   :  { %v2355_v47 = vpop.eup %1559  ;;  %1585 = vtanh.f32 %v916_v32  ;;  %v920_v9 = vadd.f32 %v919_v29, %v2243_v17  ;;  %v808_v3 = vpop.f32.mrf.mxu0 }
 0x22f   :  { %v2360_v21 = vpop.eup %1561  ;;  %1587 = vtanh.f32 %v807_v48  ;;  %v809_v50 = vadd.f32 %v808_v3, %v2243_v17  ;;  %v921_v39 = vpop.f32.mrf.mxu1 }
 0x230   :  { %v2363_v42 = vpop.eup %1563  ;;  %v1056_v10 = vpop.permute.xlu1 %1055  ;;  %1589 = vtanh.f32 %v920_v9  ;;  %v922_v62 = vadd.f32 %v921_v39, %v2243_v17 }
 0x231   :  { %v810_v58 = vpop.f32.mrf.mxu0  ;;  %v2366_v57 = vpop.eup %1565  ;;  %1591 = vtanh.f32 %v809_v50  ;;  %v1126_v26 = vmul.f32 %v2321_v4, %v1056_v10  ;;  %v1128_v31 = vmul.f32 %v2324_v51, %v1056_v10  ;;  %v1127_v63 = vmul.f32 %v2329_v61, %v1056_v10 }
 0x232   :  { %v811_v53 = vadd.f32 %v810_v58, %v2277_v35  ;;  %v923_v45 = vpop.f32.mrf.mxu1  ;;  %v2370_v34 = vpop.eup %1567  ;;  %1593 = vtanh.f32 %v922_v62  ;;  %v1129_v22 = vmul.f32 %v2334_v6, %v1056_v10 }
 0x233   :  { %v2372_v59 = vpop.permute.xlu0 %1060  ;;  %v924_v17 = vadd.f32 %v923_v45, %v2277_v35  ;;  %v812_v46 = vpop.f32.mrf.mxu0  ;;  %v1168_v14 = vadd.f32 %v1167_v28, %v1126_v26  ;;  %v1210_v43 = vadd.f32 %v1209_v16, %v1128_v31 }
 0x234   :  { %v2376_v19 = vpop.eup %1569  ;;  %1595 = vtanh.f32 %v811_v53  ;;  %v813_v20 = vadd.f32 %v812_v46, %v2277_v35  ;;  %v925_v37 = vpop.f32.mrf.mxu1  ;;  %v1130_v55 = vmul.f32 %v2341_v23, %v2372_v59  ;;  %v1231_v2 = vadd.f32 %v1230_v36, %v1129_v22 }
 0x235   :  { %v1572_v18 = vpop.eup %1571  ;;  %1597 = vtanh.f32 %v924_v17  ;;  %v926_v49 = vadd.f32 %v925_v37, %v2277_v35  ;;  %v816_v25 = vpop.f32.mrf.mxu0  ;;  %v1188_v35 = vadd.f32 %v1187_v60, %v1123_v24  ;;  %v1132_v50 = vmul.f32 %v2350_v33, %v2372_v59 }
 0x236   :  { %v1574_v11 = vpop.eup %1573  ;;  %1599 = vtanh.f32 %v813_v20  ;;  %v817_v0 = vadd.f32 %v816_v25, %v2313_v56  ;;  %v929_v41 = vpop.f32.mrf.mxu1  ;;  %v1131_v54 = vmul.f32 %v2355_v47, %v2372_v59  ;;  %v1133_v1 = vmul.f32 %v2360_v21, %v2372_v59 }
 0x237   :  { %v1576_v7 = vpop.eup %1575  ;;  %v1066_v13 = vpop.permute.xlu1 %1065  ;;  %1601 = vtanh.f32 %v926_v49  ;;  %v930_v4 = vadd.f32 %v929_v41, %v2313_v56  ;;  %v1189_v15 = vadd.f32 %v1188_v35, %v1127_v63  ;;  %v1169_v27 = vadd.f32 %v1168_v14, %v1130_v55 }
 0x238   :  { %v818_v51 = vpop.f32.mrf.mxu0  ;;  %v1578_v5 = vpop.eup %1577  ;;  %1603 = vtanh.f32 %v817_v0  ;;  %v1134_v40 = vmul.f32 %v2363_v42, %v1066_v13  ;;  %v1136_v33 = vmul.f32 %v2366_v57, %v1066_v13  ;;  %v1135_v47 = vmul.f32 %v2370_v34, %v1066_v13 }
 0x239   :  { %v819_v30 = vadd.f32 %v818_v51, %v2313_v56  ;;  %v931_v61 = vpop.f32.mrf.mxu1  ;;  %v1580_v32 = vpop.eup %1579  ;;  %1605 = vtanh.f32 %v930_v4  ;;  %v1211_v46 = vadd.f32 %v1210_v43, %v1132_v50  ;;  %v1137_v24 = vmul.f32 %v2376_v19, %v1066_v13 }
 0x23a   :  { %v1071_v38 = vpop.permute.xlu0 %1070  ;;  %v932_v48 = vadd.f32 %v931_v61, %v2313_v56  ;;  %v820_v29 = vpop.f32.mrf.mxu0  ;;  %v1190_v21 = vadd.f32 %v1189_v15, %v1131_v54  ;;  %v1170_v59 = vadd.f32 %v1169_v27, %v1134_v40 }
 0x23b   :  { %v1582_v6 = vpop.eup %1581  ;;  %1607 = vtanh.f32 %v819_v30  ;;  %v821_v9 = vadd.f32 %v820_v29, %v2343_v52  ;;  %v933_v3 = vpop.f32.mrf.mxu1  ;;  %v1138_v44 = vmul.f32 %v1572_v18, %v1071_v38  ;;  %v1140_v12 = vmul.f32 %v1574_v11, %v1071_v38 }
 0x23c   :  { %v1584_v8 = vpop.eup %1583  ;;  %1609 = vtanh.f32 %v932_v48  ;;  %v934_v39 = vadd.f32 %v933_v3, %v2343_v52  ;;  %v822_v10 = vpop.f32.mrf.mxu0  ;;  %v1139_v57 = vmul.f32 %v1576_v7, %v1071_v38  ;;  %v1212_v31 = vadd.f32 %v1211_v46, %v1136_v33 }
 0x23d   :  { %v1586_v56 = vpop.eup %1585  ;;  %1611 = vtanh.f32 %v821_v9  ;;  %v823_v23 = vadd.f32 %v822_v10, %v2343_v52  ;;  %v935_v62 = vpop.f32.mrf.mxu1  ;;  %v1141_v49 = vmul.f32 %v1578_v5, %v1071_v38  ;;  %v1191_v18 = vadd.f32 %v1190_v21, %v1135_v47 }
 0x23e   :  { %v1588_v58 = vpop.eup %1587  ;;  %v1076_v60 = vpop.permute.xlu1 %1075  ;;  %1613 = vtanh.f32 %v934_v39  ;;  %v936_v53 = vadd.f32 %v935_v62, %v2343_v52  ;;  %v1232_v52 = vadd.f32 %v1231_v2, %v1133_v1  ;;  %v1171_v28 = vadd.f32 %v1170_v59, %v1138_v44 }
 0x23f   :  { %v1590_v45 = vpop.eup %1589  ;;  %1615 = vtanh.f32 %v823_v23  ;;  %v1081_v17 = vpop.permute.xlu0 %1080  ;;  %v1142_v37 = vmul.f32 %v1580_v32, %v1076_v60  ;;  %v1144_v25 = vmul.f32 %v1582_v6, %v1076_v60  ;;  %v1143_v63 = vmul.f32 %v1584_v8, %v1076_v60 }
 0x240   :  { %v1592_v42 = vpop.eup %1591  ;;  %1617 = vtanh.f32 %v936_v53  ;;  %v1146_v0 = vmul.f32 %v1588_v58, %v1081_v17  ;;  %v1233_v19 = vadd.f32 %v1232_v52, %v1137_v24  ;;  %v1213_v11 = vadd.f32 %v1212_v31, %v1140_v12 }
 0x241   :  { %v1594_v20 = vpop.eup %1593  ;;  %v1145_v13 = vmul.f32 %v1586_v56, %v1076_v60  ;;  %v1148_v22 = vmul.f32 %v1590_v45, %v1081_v17  ;;  %v1192_v51 = vadd.f32 %v1191_v18, %v1139_v57  ;;  %v1172_v7 = vadd.f32 %v1171_v28, %v1142_v37 }
 0x242   :  { %v1596_v26 = vpop.eup %1595  ;;  %v1086_v16 = vpop.permute.xlu1 %1085  ;;  %v1147_v35 = vmul.f32 %v1592_v42, %v1081_v17  ;;  %v1234_v5 = vadd.f32 %v1233_v19, %v1141_v49  ;;  %v1214_v32 = vadd.f32 %v1213_v11, %v1144_v25  ;;  %v1149_v38 = vmul.f32 %v1594_v20, %v1081_v17 }
 0x243   :  { %v1598_v34 = vpop.eup %1597  ;;  %v1150_v36 = vmul.f32 %v1596_v26, %v1086_v16  ;;  %v1091_v61 = vpop.permute.xlu0 %1090  ;;  %v1193_v48 = vadd.f32 %v1192_v51, %v1143_v63  ;;  %v1173_v29 = vadd.f32 %v1172_v7, %v1146_v0  ;;  %v1261_v11 = vlaneseq }
 0x244   :  { %v1600_v41 = vpop.eup %1599  ;;  %v1152_v14 = vmul.f32 %v1598_v34, %v1086_v16  ;;  %v1235_v9 = vadd.f32 %v1234_v5, %v1145_v13  ;;  %v1215_v3 = vadd.f32 %v1214_v32, %v1148_v22 }
 0x245   :  { %v1602_v4 = vpop.eup %1601  ;;  %v1151_v6 = vmul.f32 %v1600_v41, %v1086_v16  ;;  %v1194_v39 = vadd.f32 %v1193_v48, %v1147_v35  ;;  %v1174_v10 = vadd.f32 %v1173_v29, %v1150_v36  ;;  %v1262_v5 = vshrl.u32 %v1261_v11, 7 }
 0x246   :  { %v1604_v30 = vpop.eup %1603  ;;  %v1153_v8 = vmul.f32 %v1602_v4, %v1086_v16  ;;  %v1096_v40 = vpop.permute.xlu1 %1095  ;;  %v1236_v23 = vadd.f32 %v1235_v9, %v1149_v38  ;;  %v1216_v62 = vadd.f32 %v1215_v3, %v1152_v14  ;;  %v1642_v16 = vmov 1966171168  }
 0x247   :  { %v1606_v43 = vpop.eup %1605  ;;  %v1154_v15 = vmul.f32 %v1604_v30, %v1091_v61  ;;  %v1195_v1 = vadd.f32 %v1194_v39, %v1151_v6  ;;  %v1259_v19 = vunpack.c.l.s4 %v1642_v16  ;;  %v1247_v14 = vstv %s2418_s6 }
 0x248   :  { %v1608_v55 = vpop.eup %1607  ;;  %v1156_v2 = vmul.f32 %v1606_v43, %v1091_v61  ;;  %v1237_v27 = vadd.f32 %v1236_v23, %v1153_v8  ;;  %vm1283_vm1 = vcmp.lt.s32.totalorder %v1261_v11, 512 }
 0x249   :  { %v1610_v50 = vpop.eup %1609  ;;  %v1155_v56 = vmul.f32 %v1608_v55, %v1091_v61  ;;  %v1175_v33 = vadd.f32 %v1174_v10, %v1154_v15 }
 0x24a   :  { %v1612_v54 = vpop.eup %1611  ;;  %v1157_v58 = vmul.f32 %v1610_v50, %v1091_v61  ;;  %v1217_v47 = vadd.f32 %v1216_v62, %v1156_v2  ;;  %v1260_v61 = vunpack.c.0.s8 %v1259_v19 }
 0x24b   :  { %v1614_v60 = vpop.eup %1613  ;;  %v1158_v53 = vmul.f32 %v1612_v54, %v1096_v40  ;;  %v1196_v17 = vadd.f32 %v1195_v1, %v1155_v56 }
 0x24c   :  { %v1616_v45 = vpop.eup %1615  ;;  %v1160_v44 = vmul.f32 %v1614_v60, %v1096_v40  ;;  %v1238_v12 = vadd.f32 %v1237_v27, %v1157_v58  ;;  %v1263_v15 = vsub.s32 %v1260_v61, %v1262_v5 }
 0x24d   :  { %v1618_v42 = vpop.eup %1617  ;;  %v1176_v46 = vadd.f32 %v1175_v33, %v1158_v53  ;;  %v1159_v24 = vmul.f32 %v1616_v45, %v1096_v40 }
 0x24e   :  { %v1218_v20 = vadd.f32 %v1217_v47, %v1160_v44  ;;  %v1161_v21 = vmul.f32 %v1618_v42, %v1096_v40 }
 0x24f   :  { %v1177_v59 = vrot.slane %v1176_v46, 4  ;;  %v1197_v57 = vadd.f32 %v1196_v17, %v1159_v24 }
 0x250   :  { %v1219_v37 = vrot.slane %v1218_v20, 4  ;;  %v1239_v26 = vadd.f32 %v1238_v12, %v1161_v21 }
 0x251   :  { %v1198_v52 = vrot.slane %v1197_v57, 4  ;;  %v1178_v31 = vadd.f32 %v1177_v59, %v1176_v46 }
 0x252   :  { %v1240_v49 = vrot.slane %v1239_v26, 4  ;;  %v1220_v25 = vadd.f32 %v1219_v37, %v1218_v20 }
 0x253   :  { %v1179_v34 = vrot.slane %v1178_v31, 2  ;;  %v1199_v18 = vadd.f32 %v1198_v52, %v1197_v57 }
 0x254   :  { %v1221_v28 = vrot.slane %v1220_v25, 2  ;;  %v1241_v63 = vadd.f32 %v1240_v49, %v1239_v26 }
 0x255   :  { %v1180_v0 = vadd.f32 %v1179_v34, %v1178_v31  ;;  %v1200_v41 = vrot.slane %v1199_v18, 2 }
 0x256   :  { %v1222_v13 = vadd.f32 %v1221_v28, %v1220_v25  ;;  %v1242_v22 = vrot.slane %v1241_v63, 2 }
 0x257   :  { %v1181_v4 = vrot.slane %v1180_v0, 1  ;;  %v1201_v51 = vadd.f32 %v1200_v41, %v1199_v18 }
 0x258   :  { %v1223_v7 = vrot.slane %v1222_v13, 1  ;;  %v1243_v35 = vadd.f32 %v1242_v22, %v1241_v63 }
 0x259   :  { %v1182_v36 = vadd.f32 %v1181_v4, %v1180_v0  ;;  %v1202_v30 = vrot.slane %v1201_v51, 1 }
 0x25a   :  { %v1224_v32 = vadd.f32 %v1223_v7, %v1222_v13  ;;  %v1244_v38 = vrot.slane %v1243_v35, 1 }
 0x25b   :  { %v1203_v43 = vadd.f32 %v1202_v30, %v1201_v51  ;;  %v1248_v29 = vadd.f32 %v1247_v14, %v1182_v36 }
 0x25c   :  { %v1245_v48 = vadd.f32 %v1244_v38, %v1243_v35  ;;  %v1250_v55 = vadd.f32 %v1247_v14, %v1224_v32 }
 0x25d   :  { %v1249_v6 = vadd.f32 %v1247_v14, %v1203_v43 }
 0x25e   :  { %v1251_v9 = vadd.f32 %v1247_v14, %v1245_v48 }
 0x25f   :  { %v1256_v3 = vcombine.low %v1248_v29, %v1249_v6 }
 0x260   :  { %v1257_v8 = vcombine.low %v1250_v55, %v1251_v9 }
 0x261   :  { %v1264_v2 = vrot.slane %v1256_v3, %v1263_v15 }
 0x262   :  { %v1271_v50 = vrot.slane %v1257_v8, %v1263_v15 }
 0x264   :  { %v1272_v39 = vcombine.low %v1264_v2, %v1271_v50 }
 0x266   :  { %v1279_v10 = vrot.slane %v1272_v39, %v1263_v15 }
 0x268   :  { %1285 = vst.msk [vmem:[#allocation3] sm:$0xf] %vm1283_vm1, %v1279_v10 }
 0x269   :  { %1630 = shalt.err (!%p1627_p4)
}
 0x26a   :  { %1295 = dma.vmem_to_hbm [thread:$0]  %s1293_s4, 64, %s2419_s7, [#allocation4]  }
 0x26b   :  { %1639 = dma.done.wait [#allocation4], 64  }
 0x26c   :  { %1640 = vsyncadd [#allocation4], 4294967232 }
 0x26d   :  { %1299 = vsyncpa [#allocation4], 1 }

</bundles_post_ra>
